<compile_context>
chip_gen: v7x
topology: tpu7x:2x2x1
jax: 0.10.0
libtpu: 0.0.40
codegen_flags: <defaults>
</compile_context>

<pallas_src>
import functools
import math

import jax
import jax.numpy as jnp
from jax.experimental import pallas as pl
from jax.experimental.pallas import tpu as pltpu


# ------------------------------ small helpers ------------------------------

def _vmem_capacity_bytes():
    try:
        return int(pltpu.get_tpu_info().vmem_capacity_bytes)
    except Exception:
        return 64 * 1024 * 1024            # conservative (v7x-sized) fallback


def _pick_tile(n, row_bytes, target_bytes):
    """Largest divisor of `n` that is a multiple of 8 with tile*row_bytes <= target.
    Falls back to the smallest valid divisor, or to the full dim (single block) when no
    multiple-of-8 divisor exists (the full dim always satisfies the (8,128) rule)."""
    divs = [d for d in range(8, n + 1, 8) if n % d == 0]
    if not divs:
        return n
    fitting = [d for d in divs if d * row_bytes <= target_bytes]
    return max(fitting) if fitting else min(divs)


def _group_matrices(num_channels, num_groups):
    gs = num_channels // num_groups
    grp = jnp.arange(num_channels) // gs
    sel = (grp[None, :] == jnp.arange(num_groups)[:, None]).astype(jnp.float32)
    return sel.T, sel, gs          # A: [C, G] (sum into groups), S: [G, C] (expand), gs


def _head_matrices(dim_h, num_heads):
    hd = dim_h // num_heads
    sel = (jnp.arange(dim_h)[:, None] // hd ==
           jnp.arange(num_heads)[None, :]).astype(jnp.float32)
    return sel, sel.T              # [D, H] head-sum, [H, D] head-expand


# ------------------------------ temb conditioning ------------------------------

def _temb_kernel(t_ref, w_ref, b_ref, on_ref, oe_ref, *, dim_h):
    t = jnp.maximum(t_ref[...], 0.0)                       # act(temb) = ReLU
    y = jnp.dot(t, w_ref[...], preferred_element_type=jnp.float32) + b_ref[...]
    bsz = t.shape[0]
    on_ref[...] = y[:, :dim_h].reshape(bsz, 1, dim_h)      # t_node
    oe_ref[...] = y[:, dim_h:].reshape(bsz, 1, dim_h)      # t_edge


def temb_linears_pallas(temb, w_node, b_node, w_edge, b_edge):
    bsz, _ = temb.shape
    dim_h = w_node.shape[1]
    w = jnp.concatenate([w_node, w_edge], axis=1)          # [T, 2D] (one fused linear)
    b = jnp.concatenate([b_node, b_edge], axis=0).reshape(1, 2 * dim_h)
    return pl.pallas_call(
        functools.partial(_temb_kernel, dim_h=dim_h),
        out_shape=(jax.ShapeDtypeStruct((bsz, 1, dim_h), jnp.float32),
                   jax.ShapeDtypeStruct((bsz, 1, dim_h), jnp.float32)),
    )(temb, w, b)


# ------------------------------ (x + t_node) * mask -> q, k, v ------------------------------

def _qkv_kernel(x_ref, tn_ref, nm_ref, wq_ref, wk_ref, wv_ref, q_ref, k_ref, v_ref):
    h = (x_ref[0] + tn_ref[0]) * nm_ref[0]                 # (x + t_node) * node_mask  [N, D]
    hb = h.astype(jnp.bfloat16)
    q_ref[0] = jnp.dot(hb, wq_ref[...], preferred_element_type=jnp.float32)
    k_ref[0] = jnp.dot(hb, wk_ref[...], preferred_element_type=jnp.float32)
    v_ref[0] = jnp.dot(hb, wv_ref[...], preferred_element_type=jnp.float32)


def qkv_pallas(x3, t_node, node_mask3, wq, wk, wv, vmem_limit):
    B, N, D = x3.shape
    spec_out = pl.BlockSpec((1, N, D), lambda b: (b, 0, 0))
    return pl.pallas_call(
        _qkv_kernel,
        out_shape=(jax.ShapeDtypeStruct((B, N, D), jnp.float32),
                   jax.ShapeDtypeStruct((B, N, D), jnp.float32),
                   jax.ShapeDtypeStruct((B, N, D), jnp.float32)),
        grid=(B,),
        in_specs=[
            pl.BlockSpec((1, N, D), lambda b: (b, 0, 0)),
            pl.BlockSpec((1, 1, D), lambda b: (b, 0, 0)),
            pl.BlockSpec((1, N, 1), lambda b: (b, 0, 0)),
            pl.BlockSpec((D, D), lambda b: (0, 0)),
            pl.BlockSpec((D, D), lambda b: (0, 0)),
            pl.BlockSpec((D, D), lambda b: (0, 0)),
        ],
        out_specs=(spec_out, spec_out, spec_out),
        compiler_params=pltpu.CompilerParams(
            dimension_semantics=("parallel",), vmem_limit_bytes=vmem_limit),
    )(x3, t_node, node_mask3, wq, wk, wv)


# ------------------ edge-gated attention + fused node epilogue (one kernel) ------------------

def _attn_node_kernel(q_ref, k_ref, v_ref, de_ref, te_ref, nms_ref, nmt_ref, x_ref,
                      gn1w_ref, gn1b_ref, gn2w_ref, gn2b_ref, a_ref, s_ref,
                      ff1w_ref, ff1b_ref, ff2w_ref, ff2b_ref,
                      we01_ref, hsel_ref, hexp_ref,
                      hmid_ref, hout_ref,
                      *, num_heads, head_dim, dim_h, group_size, eps):
    d = dim_h
    q = q_ref[0]                                            # [TQ, D] targets i
    k = k_ref[0]                                            # [N, D]  sources j
    v = v_ref[0]
    src_m = nms_ref[0]                                      # [N, 1]
    tgt_m = nmt_ref[0]                                      # [TQ, 1]
    n_src, tq = k.shape[0], q.shape[0]

    # adj[b, j, i] = node_mask[b, j] * node_mask[b, i]  (derived in-kernel, no HBM stream)
    adj = src_m[:, None, :] * tgt_m[None, :, :]             # [N, TQ, 1]

    # h_edge for edges (source j -> target i): (dense_edge[b, j, i] + t_edge[b]) * adj
    e = (de_ref[0] + te_ref[...]) * adj                     # [N, TQ, D]
    e2 = e.reshape(n_src * tq, d).astype(jnp.bfloat16)
    e01 = jnp.dot(e2, we01_ref[...], preferred_element_type=jnp.float32)   # [N*TQ, 2D]
    e0 = e01[:, :d]                                         # W_e0(e)
    e1 = e01[:, d:]                                         # W_e1(e)

    # per-head scores via block-diagonal one-hot reduction on the MXU (bf16 operands)
    kq = (k[:, None, :] * q[None, :, :]).reshape(n_src * tq, d)
    sc = jnp.dot((kq * e0).astype(jnp.bfloat16), hsel_ref[...],
                 preferred_element_type=jnp.float32)        # [N*TQ, H]
    sc = sc.reshape(n_src, tq, num_heads) * (1.0 / math.sqrt(head_dim))
    sc = jnp.where(adj > 0.0, sc, -1e30)

    # softmax over incoming sources j (axis 0) per (target, head); masked sources underflow
    # to exactly 0, fully-masked targets are zeroed by the node-mask multiply below (the
    # reference also only uses h_attn through a node_mask multiply).
    m = jnp.max(sc, axis=0, keepdims=True)
    p = jnp.exp(sc - m)
    denom = jnp.sum(p, axis=0, keepdims=True)
    inv = 1.0 / jnp.maximum(denom, 1e-30)
    alpha = (p * inv).reshape(n_src * tq, num_heads)

    # expand per-head alpha back to channels, gate with sigmoid(W_e1 e), aggregate over j
    alpha_c = jnp.dot(alpha.astype(jnp.bfloat16), hexp_ref[...],
                      preferred_element_type=jnp.float32)   # [N*TQ, D]
    msg = (alpha_c * jax.nn.sigmoid(e1)).reshape(n_src, tq, d) * v[:, None, :]
    h_attn = jnp.sum(msg, axis=0)                           # [TQ, D]

    # ---- fused node epilogue: residual + norm1_attn + mask + FF + norm2_node + mask ----
    a_mat, s_mat = a_ref[...], s_ref[...]

    def group_norm(xv, gamma, beta):
        mean = jnp.dot(jnp.dot(xv, a_mat, preferred_element_type=jnp.float32)
                       / group_size, s_mat, preferred_element_type=jnp.float32)
        msq = jnp.dot(jnp.dot(xv * xv, a_mat, preferred_element_type=jnp.float32)
                      / group_size, s_mat, preferred_element_type=jnp.float32)
        var = jnp.maximum(msq - mean * mean, 0.0)
        return (xv - mean) * jax.lax.rsqrt(var + eps) * gamma + beta

    h_res = x_ref[0] + h_attn                               # h_in1 + h_attn (dropout = 0)
    h_mid = group_norm(h_res, gn1w_ref[...], gn1b_ref[...]) * tgt_m
    hmid_ref[0] = h_mid

    midv = jnp.maximum(
        jnp.dot(h_mid.astype(jnp.bfloat16), ff1w_ref[...],
                preferred_element_type=jnp.float32) + ff1b_ref[...], 0.0)
    ff = jnp.dot(midv.astype(jnp.bfloat16), ff2w_ref[...],
                 preferred_element_type=jnp.float32) + ff2b_ref[...]
    hout_ref[0] = group_norm(h_mid + ff, gn2w_ref[...], gn2b_ref[...]) * tgt_m


def attn_node_pallas(q3, k3, v3, dense_edge, t_edge, node_mask3, x3, params,
                     num_heads, num_groups, tile_q, vmem_limit, eps=1e-6):
    B, N, _, D = dense_edge.shape
    H = num_heads
    G = num_groups
    Dh = params["ff1_w"].shape[1]
    hsel, hexp = _head_matrices(D, H)
    A, S, gs = _group_matrices(D, G)
    we01 = jnp.concatenate([params["attn_we0"], params["attn_we1"]],
                           axis=1).astype(jnp.bfloat16)      # fused [D, 2D] edge projection
    kern = functools.partial(_attn_node_kernel, num_heads=H, head_dim=D // H,
                             dim_h=D, group_size=float(gs), eps=eps)
    const2 = lambda b, i: (0, 0)
    out_spec = pl.BlockSpec((1, tile_q, D), lambda b, i: (b, i, 0))
    return pl.pallas_call(
        kern,
        out_shape=(jax.ShapeDtypeStruct((B, N, D), jnp.float32),
                   jax.ShapeDtypeStruct((B, N, D), jnp.float32)),
        grid=(B, N // tile_q),
        in_specs=[
            pl.BlockSpec((1, tile_q, D), lambda b, i: (b, i, 0)),      # q tile (targets)
            pl.BlockSpec((1, N, D), lambda b, i: (b, 0, 0)),           # k (all sources)
            pl.BlockSpec((1, N, D), lambda b, i: (b, 0, 0)),           # v (all sources)
            pl.BlockSpec((1, N, tile_q, D), lambda b, i: (b, 0, i, 0)),# edges j -> i tile
            pl.BlockSpec((1, 1, D), lambda b, i: (b, 0, 0)),           # t_edge
            pl.BlockSpec((1, N, 1), lambda b, i: (b, 0, 0)),           # node mask (sources)
            pl.BlockSpec((1, tile_q, 1), lambda b, i: (b, i, 0)),      # node mask (targets)
            pl.BlockSpec((1, tile_q, D), lambda b, i: (b, i, 0)),      # x (h_in1) tile
            pl.BlockSpec((1, D), const2), pl.BlockSpec((1, D), const2),   # norm1_attn
            pl.BlockSpec((1, D), const2), pl.BlockSpec((1, D), const2),   # norm2_node
            pl.BlockSpec((D, G), const2), pl.BlockSpec((G, D), const2),   # group matrices
            pl.BlockSpec((D, Dh), const2), pl.BlockSpec((1, Dh), const2), # ff_linear1
            pl.BlockSpec((Dh, D), const2), pl.BlockSpec((1, D), const2),  # ff_linear2
            pl.BlockSpec((D, 2 * D), const2),                             # W_e0 | W_e1
            pl.BlockSpec((D, H), const2), pl.BlockSpec((H, D), const2),   # head matrices
        ],
        out_specs=(out_spec, out_spec),
        compiler_params=pltpu.CompilerParams(
            dimension_semantics=("parallel", "parallel"),
            vmem_limit_bytes=vmem_limit),
    )(q3, k3, v3, dense_edge, t_edge, node_mask3, node_mask3, x3,
      params["gn1a_w"].reshape(1, D), params["gn1a_b"].reshape(1, D),
      params["gn2n_w"].reshape(1, D), params["gn2n_b"].reshape(1, D),
      A, S,
      params["ff1_w"].astype(jnp.bfloat16), params["ff1_b"].reshape(1, Dh),
      params["ff2_w"].astype(jnp.bfloat16), params["ff2_b"].reshape(1, D),
      we01, hsel.astype(jnp.bfloat16), hexp.astype(jnp.bfloat16))


# ------------------ edge path: outer-sum + FF + residual + GroupNorm (lane-dense) ------------------

def _edge_ff_tile(h_rows, h_all, de_flat, w3, b3, w4, b4, *, n, d):
    """h_edge outer-sum tile + node->edge FF (bf16) + residual with the ORIGINAL dense_edge."""
    tr = h_rows.shape[0]
    hb_rows = h_rows.astype(jnp.bfloat16)
    hb_all = h_all.astype(jnp.bfloat16)
    he = (hb_rows[:, None, :] + hb_all[None, :, :]).reshape(tr * n, d)          # bf16
    mid = jnp.maximum(jnp.dot(he, w3, preferred_element_type=jnp.bfloat16) + b3, 0)
    y = jnp.dot(mid, w4, preferred_element_type=jnp.float32) + b4               # f32
    return de_flat.reshape(tr * n, d) + y                                       # [tr*n, d]


def _edge_stats_kernel(hrow_ref, hall_ref, de_ref, w3_ref, b3_ref, w4_ref, b4_ref,
                       a_ref, stats_ref, *, n, d):
    @pl.when(pl.program_id(1) == 0)
    def _init():
        stats_ref[...] = jnp.zeros_like(stats_ref)

    y = _edge_ff_tile(hrow_ref[0], hall_ref[0], de_ref[0],
                      w3_ref[...], b3_ref[...], w4_ref[...], b4_ref[...], n=n, d=d)
    a_mat = a_ref[...]
    gsum = jnp.sum(jnp.dot(y, a_mat, preferred_element_type=jnp.float32),
                   axis=0, keepdims=True)                       # [1, G]
    gsq = jnp.sum(jnp.dot(y * y, a_mat, preferred_element_type=jnp.float32),
                  axis=0, keepdims=True)                        # [1, G]
    stats_ref[0] += jnp.concatenate([gsum, gsq], axis=0)        # per-(batch, group) accumulate


def _edge_norm_kernel(hrow_ref, hall_ref, de_ref, nmr_ref, nma_ref, stats_ref,
                      w3_ref, b3_ref, w4_ref, b4_ref, gw_ref, gb_ref, s_ref,
                      o_ref, *, eps, count, n, d):
    tr = hrow_ref.shape[1]
    y = _edge_ff_tile(hrow_ref[0], hall_ref[0], de_ref[0],
                      w3_ref[...], b3_ref[...], w4_ref[...], b4_ref[...], n=n, d=d)
    st = stats_ref[0]                                           # [2, G]
    mean_g = st[0:1, :] * (1.0 / count)
    msq_g = st[1:2, :] * (1.0 / count)
    var_g = jnp.maximum(msq_g - mean_g * mean_g, 0.0)
    s_mat = s_ref[...]
    mean = jnp.dot(mean_g, s_mat, preferred_element_type=jnp.float32)   # [1, D]
    var = jnp.dot(var_g, s_mat, preferred_element_type=jnp.float32)
    yn = (y - mean) * jax.lax.rsqrt(var + eps) * gw_ref[...] + gb_ref[...]
    # adj[b, p, q] = node_mask[b, p] * node_mask[b, q] (GroupNorm stats use ALL positions,
    # the mask is applied afterwards, exactly like the reference).
    adj = (nmr_ref[0][:, None, :] * nma_ref[0][None, :, :]).reshape(tr * n, 1)
    o_ref[0] = (yn * adj).reshape(tr, n * d)                    # lane-dense store


def edge_ff_groupnorm_pallas(h_dense, dense_edge_flat, node_mask3, w3, b3, w4, b4,
                             gn_w, gn_b, num_groups, tile_r, vmem_limit, eps=1e-6):
    B, N, ND = dense_edge_flat.shape
    D = ND // N
    Dh = w3.shape[1]
    G = num_groups
    A, S, gs = _group_matrices(D, G)

    # pass 1: per-(batch, group) sum / sum-of-squares of the edge-FF output (stats only;
    # the unnormalized B*N*N*D tensor never round-trips HBM)
    stats = pl.pallas_call(
        functools.partial(_edge_stats_kernel, n=N, d=D),
        out_shape=jax.ShapeDtypeStruct((B, 2, G), jnp.float32),
        grid=(B, N // tile_r),
        in_specs=[
            pl.BlockSpec((1, tile_r, D), lambda b, i: (b, i, 0)),
            pl.BlockSpec((1, N, D), lambda b, i: (b, 0, 0)),
            pl.BlockSpec((1, tile_r, N * D), lambda b, i: (b, i, 0)),   # lane-dense edges
            pl.BlockSpec((D, Dh), lambda b, i: (0, 0)),
            pl.BlockSpec((1, Dh), lambda b, i: (0, 0)),
            pl.BlockSpec((Dh, D), lambda b, i: (0, 0)),
            pl.BlockSpec((1, D), lambda b, i: (0, 0)),
            pl.BlockSpec((D, G), lambda b, i: (0, 0)),
        ],
        out_specs=pl.BlockSpec((1, 2, G), lambda b, i: (b, 0, 0)),
        compiler_params=pltpu.CompilerParams(
            dimension_semantics=("parallel", "arbitrary"),
            vmem_limit_bytes=vmem_limit),
    )(h_dense, h_dense, dense_edge_flat, w3, b3, w4, b4, A)

    # pass 2: recompute the cheap FF tile, normalize with the per-batch stats, mask, store
    # lane-dense [B, N, N*D].
    kern = functools.partial(_edge_norm_kernel, eps=eps, count=float(N * N * gs), n=N, d=D)
    return pl.pallas_call(
        kern,
        out_shape=jax.ShapeDtypeStruct((B, N, N * D), jnp.float32),
        grid=(B, N // tile_r),
        in_specs=[
            pl.BlockSpec((1, tile_r, D), lambda b, i: (b, i, 0)),
            pl.BlockSpec((1, N, D), lambda b, i: (b, 0, 0)),
            pl.BlockSpec((1, tile_r, N * D), lambda b, i: (b, i, 0)),   # lane-dense edges
            pl.BlockSpec((1, tile_r, 1), lambda b, i: (b, i, 0)),       # node mask (rows)
            pl.BlockSpec((1, N, 1), lambda b, i: (b, 0, 0)),            # node mask (cols)
            pl.BlockSpec((1, 2, G), lambda b, i: (b, 0, 0)),
            pl.BlockSpec((D, Dh), lambda b, i: (0, 0)),
            pl.BlockSpec((1, Dh), lambda b, i: (0, 0)),
            pl.BlockSpec((Dh, D), lambda b, i: (0, 0)),
            pl.BlockSpec((1, D), lambda b, i: (0, 0)),
            pl.BlockSpec((1, D), lambda b, i: (0, 0)),
            pl.BlockSpec((1, D), lambda b, i: (0, 0)),
            pl.BlockSpec((G, D), lambda b, i: (0, 0)),
        ],
        out_specs=pl.BlockSpec((1, tile_r, N * D), lambda b, i: (b, i, 0)),
        compiler_params=pltpu.CompilerParams(
            dimension_semantics=("parallel", "parallel"),
            vmem_limit_bytes=vmem_limit),
    )(h_dense, h_dense, dense_edge_flat, node_mask3, node_mask3, stats,
      w3, b3, w4, b4, gn_w, gn_b, S)


# ------------------------------ forward (thin glue) ------------------------------

def hybrid_mp_block_forward(params, x, dense_edge, node_mask, adj_mask, temb,
                            *, num_heads, num_groups, tq=None, tr=None):
    B, N, _, D = dense_edge.shape
    x3 = x.reshape(B, N, D)
    node_mask3 = node_mask.reshape(B, N, 1)
    # adj_mask is assumed to factor as node_mask[:,:,None]*node_mask[:,None,:] (how it is
    # built upstream); it is re-derived in-kernel from node_mask so no lane-padded
    # [B,N,N,1] tensor is ever streamed.
    # TODO(synk): pass a lane-packed adjacency if a non-factorizable adj_mask is ever used.
    del adj_mask
    dense_edge_flat = dense_edge.reshape(B, N, N * D)        # free, lane-dense view

    vmem_cap = _vmem_capacity_bytes()
    vmem_limit = (vmem_cap * 3) // 4                         # generation-aware scoped VMEM
    if tr is None:
        tr = _pick_tile(N, N * D * 4, vmem_cap // 20)        # edge-FF row tile
    if tq is None:
        tq = _pick_tile(N, N * max(D, 128) * 4, vmem_cap // 32)  # attention target tile

    # temb conditioning projections (tiny, one fused linear; ReLU fused in-kernel)
    t_node, t_edge = temb_linears_pallas(
        temb, params["t_node_w"], params["t_node_b"],
        params["t_edge_w"], params["t_edge_b"])

    # (x + t_node) * node_mask -> q, k, v (whole-N-per-batch tile)
    q3, k3, v3 = qkv_pallas(
        x3, t_node, node_mask3,
        params["attn_wq"].astype(jnp.bfloat16),
        params["attn_wk"].astype(jnp.bfloat16),
        params["attn_wv"].astype(jnp.bfloat16),
        vmem_limit)

    # global FullTrans_1 (EdgeGateTransLayer) + fused node epilogue
    # (residual + norm1_attn + mask + FF + norm2_node + mask): h_attn never hits HBM.
    h_mid, h_out = attn_node_pallas(
        q3, k3, v3, dense_edge, t_edge, node_mask3, x3, params,
        num_heads, num_groups, tq, vmem_limit)

    # edge path: outer-sum + FF (+ residual with original dense_edge) + norm2_edge
    # (per-(batch, group) stats over C_g x N x N, two-pass) + adj mask, lane-dense I/O.
    edge_flat = edge_ff_groupnorm_pallas(
        h_mid, dense_edge_flat, node_mask3,
        params["ff3_w"].astype(jnp.bfloat16),
        params["ff3_b"].reshape(1, -1).astype(jnp.bfloat16),
        params["ff4_w"].astype(jnp.bfloat16),
        params["ff4_b"].reshape(1, -1),
        params["gn2e_w"].reshape(1, -1), params["gn2e_b"].reshape(1, -1),
        num_groups, tr, vmem_limit)

    return h_out.reshape(B * N, D), edge_flat.reshape(B, N, N, D)


# ------------------------------ params / demo ------------------------------

def init_params(key, dim_h, temb_dim):
    def lin(k, fi, fo, bias=True):
        k1, k2 = jax.random.split(k)
        bound = 1.0 / math.sqrt(fi)
        w = jax.random.uniform(k1, (fi, fo), jnp.float32, -bound, bound)
        b = jax.random.uniform(k2, (fo,), jnp.float32, -bound, bound) if bias else None
        return w, b

    keys = jax.random.split(key, 11)
    p = {}
    p["t_node_w"], p["t_node_b"] = lin(keys[0], temb_dim, dim_h)
    p["t_edge_w"], p["t_edge_b"] = lin(keys[1], temb_dim, dim_h)
    p["attn_wq"], _ = lin(keys[2], dim_h, dim_h, bias=False)
    p["attn_wk"], _ = lin(keys[3], dim_h, dim_h, bias=False)
    p["attn_wv"], _ = lin(keys[4], dim_h, dim_h, bias=False)
    p["attn_we0"], _ = lin(keys[5], dim_h, dim_h, bias=False)
    p["attn_we1"], _ = lin(keys[6], dim_h, dim_h, bias=False)
    p["ff1_w"], p["ff1_b"] = lin(keys[7], dim_h, 2 * dim_h)
    p["ff2_w"], p["ff2_b"] = lin(keys[8], 2 * dim_h, dim_h)
    p["ff3_w"], p["ff3_b"] = lin(keys[9], dim_h, 2 * dim_h)
    p["ff4_w"], p["ff4_b"] = lin(keys[10], 2 * dim_h, dim_h)
    ones = jnp.ones((dim_h,), jnp.float32)
    zeros = jnp.zeros((dim_h,), jnp.float32)
    p["gn1a_w"], p["gn1a_b"] = ones, zeros    # norm1_attn
    p["gn2n_w"], p["gn2n_b"] = ones, zeros    # norm2_node
    p["gn2e_w"], p["gn2e_b"] = ones, zeros    # norm2_edge
    return p


if __name__ == "__main__":
    B, N, D, H, T = 2, 8, 32, 4, 16
    G = min(D // 4, 32)                       # GroupNorm num_groups = min(dim_h//4, 32)
    root = jax.random.PRNGKey(0)
    kp, kx, ke, kt = jax.random.split(root, 4)
    params = init_params(kp, D, T)
    x = jax.random.normal(kx, (B * N, D), jnp.float32)
    dense_edge = jax.random.normal(ke, (B, N, N, D), jnp.float32)
    temb = jax.random.normal(kt, (B, T), jnp.float32)
    node_mask = jnp.ones((B, N), jnp.float32).at[1, N - 1].set(0.0)
    adj_mask = (node_mask[:, :, None] * node_mask[:, None, :])[..., None]

    h_out, edge_out = hybrid_mp_block_forward(params, x, dense_edge, node_mask,
                                              adj_mask, temb,
                                              num_heads=H, num_groups=G)
    h_out, edge_out = jax.block_until_ready((h_out, edge_out))
    assert h_out.shape == (B * N, D) and edge_out.shape == (B, N, N, D)
    assert bool(jnp.all(jnp.isfinite(h_out))) and bool(jnp.all(jnp.isfinite(edge_out)))
    print("KERNEL_OK")
</pallas_src>

<mosaic_0001>
module attributes {stable_mosaic.version = 11 : i64} {
  func.func @_temb_kernel(%arg0: memref<2x16xf32, #tpu.memory_space<vmem>>, %arg1: memref<16x64xf32, #tpu.memory_space<vmem>>, %arg2: memref<1x64xf32, #tpu.memory_space<vmem>>, %arg3: memref<2x1x32xf32, #tpu.memory_space<vmem>>, %arg4: memref<2x1x32xf32, #tpu.memory_space<vmem>>) attributes {dimension_semantics = [], scalar_prefetch = 0 : i64, scratch_operands = 0 : i64, tpu.core_type = #tpu.core_type<tc>} {
    %c0 = arith.constant 0 : index
    %c0_0 = arith.constant 0 : index
    %0 = vector.load %arg0[%c0, %c0_0] : memref<2x16xf32, #tpu.memory_space<vmem>>, vector<2x16xf32>
    %cst = arith.constant 0.000000e+00 : f32
    %1 = vector.broadcast %cst : f32 to vector<2x16xf32>
    %2 = arith.maximumf %0, %1 : vector<2x16xf32>
    %c0_1 = arith.constant 0 : index
    %c0_2 = arith.constant 0 : index
    %3 = vector.load %arg1[%c0_1, %c0_2] : memref<16x64xf32, #tpu.memory_space<vmem>>, vector<16x64xf32>
    %cst_3 = arith.constant dense<0.000000e+00> : vector<2x64xf32>
    %4 = tpu.matmul %2, %3, %cst_3 {dimension_numbers = #tpu.dot_dimension_numbers<[1], [0], [0], [1], [0, 0, 1, 1], [], []>} : vector<2x16xf32>, vector<16x64xf32>, vector<2x64xf32> -> vector<2x64xf32>
    %c0_4 = arith.constant 0 : index
    %c0_5 = arith.constant 0 : index
    %5 = vector.load %arg2[%c0_4, %c0_5] : memref<1x64xf32, #tpu.memory_space<vmem>>, vector<1x64xf32>
    %6 = vector.broadcast %5 : vector<1x64xf32> to vector<2x64xf32>
    %7 = arith.addf %4, %6 : vector<2x64xf32>
    %8 = vector.extract_strided_slice %7 {offsets = [0, 0], sizes = [2, 32], strides = [1, 1]} : vector<2x64xf32> to vector<2x32xf32>
    %9 = vector.shape_cast %8 : vector<2x32xf32> to vector<2x1x32xf32>
    %c0_6 = arith.constant 0 : index
    %c0_7 = arith.constant 0 : index
    %c0_8 = arith.constant 0 : index
    %10 = vector.load %arg3[%c0_6, %c0_7, %c0_8] : memref<2x1x32xf32, #tpu.memory_space<vmem>>, vector<2x1x32xf32>
    tpu.vector_store %arg3[%c0_6, %c0_7, %c0_8], %9 {strides = array<i32>} : memref<2x1x32xf32, #tpu.memory_space<vmem>>, vector<2x1x32xf32>,
    %11 = vector.extract_strided_slice %7 {offsets = [0, 32], sizes = [2, 32], strides = [1, 1]} : vector<2x64xf32> to vector<2x32xf32>
    %12 = vector.shape_cast %11 : vector<2x32xf32> to vector<2x1x32xf32>
    %c0_9 = arith.constant 0 : index
    %c0_10 = arith.constant 0 : index
    %c0_11 = arith.constant 0 : index
    %13 = vector.load %arg4[%c0_9, %c0_10, %c0_11] : memref<2x1x32xf32, #tpu.memory_space<vmem>>, vector<2x1x32xf32>
    tpu.vector_store %arg4[%c0_9, %c0_10, %c0_11], %12 {strides = array<i32>} : memref<2x1x32xf32, #tpu.memory_space<vmem>>, vector<2x1x32xf32>,
    return
  }
}

</mosaic_0001>

<bundles_post_ra>
// kernel: tpu_custom_call.1
= control target key start
LH: loop header
LB: loop body
LE: loop exit
PB: predicated region body
PF: predicated region fallthrough
CT: control target
= control target key end

     0   :  { %10 = vsyncpa [#allocation3], 0  ;;  %s431_s0 = inlined_call_operand.hbm [shape: f32[2,16], index: 0, kind: input, shape index: {}]   ;;  %s432_s1 = inlined_call_operand.hbm [shape: f32[16,64], index: 1, kind: input, shape index: {}]   ;;  %s433_s2 = inlined_call_operand.vmem [shape: f32[1,64], index: 2, kind: input, shape index: {}]   ;;  %s434_s3 = inlined_call_operand.hbm [shape: f32[2,1,32], index: 3, kind: output, shape index: {0}]   ;;  %s435_s4 = inlined_call_operand.hbm [shape: f32[2,1,32], index: 4, kind: output, shape index: {1}]  }
   0x1   :  { %11 = vsyncpa [#allocation6], 0 }
   0x2   :  { %12 = vsyncpa [#allocation4], 0 }
   0x3   :  { %13 = vsyncpa [#allocation9], 0  ;;  %s331_s15 = smov [#allocation2]   ;;  %s332_s17 = smov [#allocation5]  }
   0x4   :  { %s20_s16 = sshll.u32 %s331_s15, 4  ;;  %s29_s18 = sshll.u32 %s332_s17, 4  ;;  %s21_s16 = int_to_ptr.vmem [resolvable:$true] %s20_s16  ;;  %s369_s18 = int_to_ptr.vmem [resolvable:$true] %s29_s18 }
   0x5   :  { %s235_s21 = scalar_lea.hbm %s431_s0, 32 }
   0x6   :  { %p236_p0 = scmp.ne.s32.totalorder %s431_s0, %s235_s21  ;;  %p239_p1 = scmp.lt.u32.totalorder %s235_s21, %s431_s0 }
   0x8   :  { %p241_p2 = pnand %p239_p1, %p236_p0 }
   0xa   :  { %244 = shalt.err (!%p241_p2)
}
   0xb   :  { %s245_s26 = scalar_lea.vmem %s21_s16, 32  ;;  %p250_p4 = scmp.lt.s32.totalorder %s21_s16, %s21_s16 }
   0xc   :  { %p246_p3 = scmp.ne.s32.totalorder %s21_s16, %s245_s26  ;;  %p251_p5 = scmp.lt.s32.totalorder %s245_s26, %s245_s26 }
   0xe   :  { %p252_p6 = por %p251_p5, %p250_p4 }
  0x10   :  { %p253_p7 = pnand %p252_p6, %p246_p3 }
  0x12   :  { %256 = shalt.err (!%p253_p7)
}
  0x13   :  { %23 = dma.hbm_to_vmem [thread:$0]  %s431_s0, 32, %s21_s16, [#allocation3]  }
  0x14   :  { %s257_s5 = scalar_lea.hbm %s432_s1, 256 }
  0x15   :  { %p258_p8 = scmp.ne.s32.totalorder %s432_s1, %s257_s5  ;;  %p261_p9 = scmp.lt.u32.totalorder %s257_s5, %s432_s1 }
  0x17   :  { %p263_p10 = pnand %p261_p9, %p258_p8 }
  0x19   :  { %266 = shalt.err (!%p263_p10)
}
  0x1a   :  { %s267_s10 = scalar_lea.vmem %s369_s18, 256  ;;  %p272_p12 = scmp.lt.s32.totalorder %s369_s18, %s369_s18 }
  0x1b   :  { %p268_p11 = scmp.ne.s32.totalorder %s369_s18, %s267_s10  ;;  %p273_p13 = scmp.lt.s32.totalorder %s267_s10, %s267_s10 }
  0x1d   :  { %p274_p0 = por %p273_p13, %p272_p12 }
  0x1f   :  { %p275_p1 = pnand %p274_p0, %p268_p11 }
  0x21   :  { %278 = shalt.err (!%p275_p1)
}
  0x22   :  { %s333_s0 = smov 128   ;;  %s334_s11 = smov 8  }
  0x23   :  { %35 = dma.hbm_to_vmem [thread:$0]  %s432_s1, 256, %s369_s18, [#allocation6], %s333_s0, %s333_s0, %s334_s11  }
  0x24   :  { %323 = dma.done.wait [#allocation3], 32  }
  0x25   :  { %324 = vsyncadd [#allocation3], 4294967264 }
  0x26   :  { %325 = dma.done.wait [#allocation6], 256  }
  0x27   :  { %326 = vsyncadd [#allocation6], 4294967040  ;;  %v335_v0 = vmov 0.0|0.0   ;;  %vm336_vm0 = vmmov 0   ;;  %v337_v1 = vmov 0.0   ;;  %v46_v2 = vld [vmem:[#allocation5] sm:$0xff]  ;;  %v133_v9 = vlaneseq }
  0x28   :  { %219 = vmatprep.subr.bf16.mxu0 %v335_v0  ;;  %216 = vmatprep.mubr.msk.f32.mxu0 %vm336_vm0, %v337_v1  ;;  %v47_v3 = vld [vmem:[#allocation5 + $0x8] sm:$0xff]  ;;  %v44_v4 = vld [vmem:[#allocation2] sm:$0x3]  ;;  %vm55_vm1 = vcmask 130048   ;;  %v338_v7 = vmov 1966171168  }
  0x29   :  { %v220_v5 = vpack.c.bf16 %v47_v3, %v46_v2  ;;  %v45_v6 = vmax.f32 %v44_v4, 0.0  ;;  %v131_v8 = vunpack.c.l.s4 %v338_v7  ;;  %v134_v11 = vshrl.u32 %v133_v9, 7  ;;  %v207_v12 = vld [vmem:[%s433_s2] ss:$0 sm:$0xff]  ;;  %s339_s15 = smov [#allocation7]   ;;  %s340_s17 = smov 96  }
  0x2a   :  { %s178_s16 = sshll.u32 %s339_s15, 4  ;;  %vm154_vm2 = vcmask 253952   ;;  %s179_s16 = int_to_ptr.vmem [resolvable:$true] %s178_s16 }
  0x2b   :  { %221 = vmatpush3.bf16.msra.mxu0 %v220_v5  ;;  %v132_v10 = vunpack.c.0.s8 %v131_v8  ;;  %v159_v18 = vsub.s32 0, %v134_v11  ;;  %s279_s2 = scalar_lea.vmem %s179_s16, 32  ;;  %p284_p3 = scmp.lt.s32.totalorder %s179_s16, %s179_s16 }
  0x2c   :  { %p280_p2 = scmp.ne.s32.totalorder %s179_s16, %s279_s2  ;;  %p285_p4 = scmp.lt.s32.totalorder %s279_s2, %s279_s2 }
  0x2d   :  { %v135_v13 = vsub.s32 %v132_v10, %v134_v11 }
  0x2e   :  { %217 = vmatmul.mubr.msk.f32.vlgmr.msra.gmra.mrb[0].mxu0 %vm55_vm1, %v45_v6  ;;  %p286_p5 = por %p285_p4, %p284_p3 }
  0x30   :  { %p287_p6 = pnand %p286_p5, %p280_p2 }
 0x101   :  { %v125_v14 = vpop.f32.mrb[0].mxu0 }
 0x102   :  { %v126_v15 = vadd.f32 %v207_v12, %v125_v14  ;;  %v218_v16 = vpop.f32.mrb[1].mxu0 }
 0x104   :  { %v136_v17 = vrot.slane %v126_v15, %v135_v13 }
 0x106   :  { %v137_v19 = vcombine.high %v136_v17, %v136_v17  ;;  %v144_v20 = vrot.slane %v136_v17, %v135_v13 }
 0x108   :  { %v160_v21 = vrot.slane %v144_v20, %v159_v18  ;;  %v151_v22 = vrot.slane %v137_v19, %v135_v13  ;;  %155 = vst.msk [vmem:[#allocation7] sm:$0x1] %vm154_vm2, %v144_v20 }
 0x10a   :  { %165 = vrot.lane.b32.xlu0 %v160_v21, %s340_s17  ;;  %156 = vst.msk [vmem:[#allocation7 + $0x1] sm:$0x1] %vm154_vm2, %v151_v22 }
 0x10b   :  { %290 = shalt.err (!%p287_p6)
}
 0x10c   :  { %s291_s20 = scalar_lea.hbm %s434_s3, 32 }
 0x10d   :  { %p292_p7 = scmp.ne.s32.totalorder %s434_s3, %s291_s20  ;;  %p295_p8 = scmp.lt.u32.totalorder %s291_s20, %s434_s3 }
 0x10f   :  { %p297_p9 = pnand %p295_p8, %p292_p7 }
 0x111   :  { %300 = shalt.err (!%p297_p9)
}
 0x112   :  { %s341_s25 = smov 16   ;;  %s342_s26 = smov 1   ;;  %v164_v23 = vrot.slane %v151_v22, %v159_v18 }
 0x113   :  { %184 = dma.vmem_to_hbm [thread:$0]  %s179_s16, 32, %s434_s3, [#allocation4], %s341_s25, %s341_s25, %s342_s26  }
 0x114   :  { %167 = vrot.lane.b32.xlu0 %v164_v23, %s340_s17  ;;  %s343_s29 = smov [#allocation8]  }
 0x115   :  { %s190_s30 = sshll.u32 %s343_s29, 4  ;;  %s191_s30 = int_to_ptr.vmem [resolvable:$true] %s190_s30 }
 0x116   :  { %s301_s5 = scalar_lea.vmem %s191_s30, 32  ;;  %p306_p11 = scmp.lt.s32.totalorder %s191_s30, %s191_s30 }
 0x117   :  { %p302_p10 = scmp.ne.s32.totalorder %s191_s30, %s301_s5  ;;  %p307_p12 = scmp.lt.s32.totalorder %s301_s5, %s301_s5 }
 0x119   :  { %p308_p13 = por %p307_p12, %p306_p11 }
 0x11b   :  { %p309_p0 = pnand %p308_p13, %p302_p10 }
 0x17c   :  { %v166_v24 = vpop.permute.xlu0 %165 }
 0x17d   :  { %171 = vst.msk [vmem:[#allocation8] sm:$0x1] %vm154_vm2, %v166_v24 }
 0x186   :  { %v168_v25 = vpop.permute.xlu0 %167 }
 0x187   :  { %172 = vst.msk [vmem:[#allocation8 + $0x1] sm:$0x1] %vm154_vm2, %v168_v25 }
 0x188   :  { %312 = shalt.err (!%p309_p0)
}
 0x189   :  { %s313_s7 = scalar_lea.hbm %s435_s4, 32 }
 0x18a   :  { %p314_p1 = scmp.ne.s32.totalorder %s435_s4, %s313_s7  ;;  %p317_p2 = scmp.lt.u32.totalorder %s313_s7, %s435_s4 }
 0x18c   :  { %p319_p3 = pnand %p317_p2, %p314_p1 }
 0x18e   :  { %322 = shalt.err (!%p319_p3)
}
 0x18f   :  { %196 = dma.vmem_to_hbm [thread:$0]  %s191_s30, 32, %s435_s4, [#allocation9], %s341_s25, %s341_s25, %s342_s26  }
 0x190   :  { %327 = dma.done.wait [#allocation4], 32  }
 0x191   :  { %328 = vsyncadd [#allocation4], 4294967264 }
 0x192   :  { %329 = dma.done.wait [#allocation9], 32  }
 0x193   :  { %330 = vsyncadd [#allocation9], 4294967264 }
 0x194   :  { %203 = vsyncpa [#allocation3], 1 }
 0x195   :  { %204 = vsyncpa [#allocation6], 1 }
 0x196   :  { %205 = vsyncpa [#allocation4], 1 }
 0x197   :  { %206 = vsyncpa [#allocation9], 1 }

</bundles_post_ra>
